<compile_context>
chip_gen: v7x
topology: tpu7x:2x2x1
jax: 0.10.0
libtpu: 0.0.40
codegen_flags: <defaults>
</compile_context>

<pallas_src>
import functools

import jax
import jax.numpy as jnp
from jax.experimental import pallas as pl
from jax.experimental.pallas import tpu as pltpu

LANE = 128


def _round_up(n, m):
    return ((n + m - 1) // m) * m


def _pad2d(a, rows, cols):
    return jnp.pad(a, ((0, rows - a.shape[0]), (0, cols - a.shape[1])))


def _pick_spatial_tile(hw, want):
    """Largest multiple-of-8 divisor of hw that is <= want."""
    want = min(want, hw)
    for t in range(want, 7, -1):
        if hw % t == 0 and t % 8 == 0:
            return t
    raise ValueError(f"H*W={hw} has no multiple-of-8 tile <= {want}")


def im2col_3x3(x_nchw):
    """3x3 / stride-1 / pad-1 im2col in NHWC tap-concat layout.

    Returns (B, H*W, 9*C) with feature index = (dy*3 + dx)*C + c, in the input
    dtype (no arithmetic is performed).  Loading a real PyTorch conv weight
    (E, C, 3, 3) would need the matching transpose to (3, 3, C, E).reshape(9C, E);
    the synthetic params below are built directly in that layout.
    """
    B, C, H, W = x_nchw.shape
    x = jnp.transpose(x_nchw, (0, 2, 3, 1))               # NCHW -> NHWC
    xp = jnp.pad(x, ((0, 0), (1, 1), (1, 1), (0, 0)))
    taps = [xp[:, dy:dy + H, dx:dx + W, :]
            for dy in range(3) for dx in range(3)]
    patches = jnp.concatenate(taps, axis=-1)              # (B, H, W, 9C)
    return patches.reshape(B, H * W, 9 * C)


# ----------------------------------------------------------------------------
# Kernel 1: backbone — conv(as matmul) + ReLU + global-average-pool.
# ----------------------------------------------------------------------------
def backbone_kernel(patches_ref, wc_ref, bc_ref, embs_ref, acc_ref, *, inv_hw):
    j = pl.program_id(1)

    @pl.when(j == 0)
    def _():
        acc_ref[...] = jnp.zeros_like(acc_ref)

    # 3x3 conv as (THW, CK) @ (CK, Ep) MXU matmul: bf16 in, f32 accumulate.
    h = jnp.dot(patches_ref[...], wc_ref[...],
                preferred_element_type=jnp.float32)        # (THW, Ep) f32
    h = jnp.maximum(h + bc_ref[...], 0.0)

    # Partial global-average-pool: cross-sublane sum (VPU/XLU), keeping the MXU
    # push slot exclusively for the conv matmul.
    acc_ref[...] += jnp.sum(h, axis=0, keepdims=True)

    @pl.when(j == pl.num_programs(1) - 1)
    def _():
        embs_ref[...] = (acc_ref[...] * inv_hw).astype(embs_ref.dtype)


# ----------------------------------------------------------------------------
# Kernel 2: CLFBlock head — Linear -> ReLU -> Linear -> LogSoftmax, batched
# over all B in one shot (M = B instead of M = 1 inside the grid).
# ----------------------------------------------------------------------------
def clf_head_kernel(embs_ref, w1_ref, b1_ref, w2_ref, b2_ref, logits_ref, *,
                    num_classes):
    z1 = jnp.dot(embs_ref[...], w1_ref[...],
                 preferred_element_type=jnp.float32) + b1_ref[...]
    z1 = jnp.maximum(z1, 0.0)
    z2 = jnp.dot(z1, w2_ref[...],
                 preferred_element_type=jnp.float32) + b2_ref[...]

    # Mask padded class lanes out of the softmax normalizer (-1e30, not -inf,
    # so a row never becomes all -inf -> NaN).
    col = jax.lax.broadcasted_iota(jnp.int32, z2.shape, 1)
    z2 = jnp.where(col < num_classes, z2, -1e30)
    m = jnp.max(z2, axis=-1, keepdims=True)
    lse = m + jnp.log(jnp.sum(jnp.exp(z2 - m), axis=-1, keepdims=True))
    logits_ref[...] = (z2 - lse).astype(logits_ref.dtype)


def evnet_forward(x_nchw, params, *, thw=1024):
    """Returns (embs, clf_logits) exactly like EvNetModel.forward."""
    B, C, H, W = x_nchw.shape
    HW = H * W
    E = params["wc"].shape[1]
    NH = params["w1"].shape[1]
    NC = params["w2"].shape[1]

    thw = _pick_spatial_tile(HW, thw)

    # Wrapper-side im2col in bf16 (cast *before* the tap-concat so the blown-up
    # intermediate round-trips HBM at 2 bytes/elem), NO lane padding on the
    # streamed contraction dim.
    patches = im2col_3x3(x_nchw.astype(jnp.bfloat16))      # (B, HW, 9C) bf16
    CK = patches.shape[-1]
    Ep = _round_up(E, LANE)
    Hp = _round_up(NH, LANE)
    NCp = _round_up(NC, LANE)
    Bp = _round_up(B, 8)

    wc_p = _pad2d(params["wc"], CK, Ep).astype(jnp.bfloat16)   # resident weights
    bc_p = _pad2d(params["bc"], 1, Ep).astype(jnp.float32)
    w1_p = _pad2d(params["w1"], Ep, Hp).astype(jnp.float32)    # tiny head: f32
    b1_p = _pad2d(params["b1"], 1, Hp).astype(jnp.float32)
    w2_p = _pad2d(params["w2"], Hp, NCp).astype(jnp.float32)
    b2_p = _pad2d(params["b2"], 1, NCp).astype(jnp.float32)

    # --- Backbone: conv + ReLU + global average pool --------------------------
    embs_p = pl.pallas_call(
        functools.partial(backbone_kernel, inv_hw=1.0 / HW),
        out_shape=jax.ShapeDtypeStruct((B, 1, Ep), jnp.float32),
        grid_spec=pltpu.PrefetchScalarGridSpec(
            num_scalar_prefetch=0,
            grid=(B, HW // thw),
            in_specs=[
                # patch stream: tiled over (batch, spatial); auto double-buffered;
                # last block dim == full contraction dim CK (no lane pad).
                pl.BlockSpec((None, thw, CK), lambda b, j: (b, j, 0)),
                # conv weight / bias: VMEM-resident across the whole grid.
                pl.BlockSpec((CK, Ep), lambda b, j: (0, 0)),
                pl.BlockSpec((1, Ep), lambda b, j: (0, 0)),
            ],
            out_specs=pl.BlockSpec((None, 1, Ep), lambda b, j: (b, 0, 0)),
            scratch_shapes=[pltpu.VMEM((1, Ep), jnp.float32)],
        ),
        compiler_params=pltpu.CompilerParams(
            dimension_semantics=("parallel", "arbitrary"),
            vmem_limit_bytes=32 * 1024 * 1024,
        ),
    )(patches, wc_p, bc_p)

    embs_pad = jnp.pad(embs_p.reshape(B, Ep), ((0, Bp - B), (0, 0)))

    # --- CLF head: one tiny pallas_call batched over all B ---------------------
    logits_p = pl.pallas_call(
        functools.partial(clf_head_kernel, num_classes=NC),
        out_shape=jax.ShapeDtypeStruct((Bp, NCp), jnp.float32),
        grid_spec=pltpu.PrefetchScalarGridSpec(
            num_scalar_prefetch=0,
            grid=(1,),
            in_specs=[
                pl.BlockSpec((Bp, Ep), lambda i: (0, 0)),
                pl.BlockSpec((Ep, Hp), lambda i: (0, 0)),
                pl.BlockSpec((1, Hp), lambda i: (0, 0)),
                pl.BlockSpec((Hp, NCp), lambda i: (0, 0)),
                pl.BlockSpec((1, NCp), lambda i: (0, 0)),
            ],
            out_specs=pl.BlockSpec((Bp, NCp), lambda i: (0, 0)),
        ),
        compiler_params=pltpu.CompilerParams(
            dimension_semantics=("arbitrary",),
        ),
    )(embs_pad, w1_p, b1_p, w2_p, b2_p)

    # Slice lane/batch-padded outputs back to model dims.
    embs = embs_p[:, 0, :E]
    # clf_logits = stack([head(embs)]).mean(0) over a single head == head(embs).
    logits = logits_p[:B, :NC]
    return embs, logits


# ----------------------------------------------------------------------------
# Pure-JAX f32 reference for correctness check.
# ----------------------------------------------------------------------------
def evnet_reference(x_nchw, params):
    patches = im2col_3x3(x_nchw)
    B, HW, CK = patches.shape
    E = params["wc"].shape[1]
    h = jnp.maximum(patches.reshape(B * HW, CK) @ params["wc"] + params["bc"], 0.0)
    embs = jnp.mean(h.reshape(B, HW, E), axis=1)
    z1 = jnp.maximum(embs @ params["w1"] + params["b1"], 0.0)
    z2 = z1 @ params["w2"] + params["b2"]
    logits = z2 - jax.scipy.special.logsumexp(z2, axis=-1, keepdims=True)
    return embs, logits


# ----------------------------------------------------------------------------
# Deterministic parameter construction (synthetic; no checkpoint loading).
# ----------------------------------------------------------------------------
def init_params(key, in_channels, embed_dims, clf_hidden, num_classes):
    k = jax.random.split(key, 6)
    wc = 0.1 * jax.random.normal(k[0], (in_channels * 9, embed_dims), jnp.float32)
    bc = 0.01 * jax.random.normal(k[1], (1, embed_dims), jnp.float32)
    w1 = 0.1 * jax.random.normal(k[2], (embed_dims, clf_hidden), jnp.float32)
    b1 = 0.01 * jax.random.normal(k[3], (1, clf_hidden), jnp.float32)
    w2 = 0.1 * jax.random.normal(k[4], (clf_hidden, num_classes), jnp.float32)
    b2 = 0.01 * jax.random.normal(k[5], (1, num_classes), jnp.float32)
    return dict(wc=wc, bc=bc, w1=w1, b1=b1, w2=w2, b2=b2)


if __name__ == "__main__":
    # Small shapes consistent with the module's conv backbone + classifier head.
    B, C, H, W = 2, 4, 16, 16          # NCHW input, like PyTorch
    EMBED_DIMS = 32                    # backbone_params['embed_dims']
    CLF_HIDDEN = 32
    NUM_CLASSES = 10

    key = jax.random.PRNGKey(0)
    kx, kp = jax.random.split(key)
    x = jax.random.normal(kx, (B, C, H, W), jnp.float32)
    params = init_params(kp, C, EMBED_DIMS, CLF_HIDDEN, NUM_CLASSES)

    embs, logits = evnet_forward(x, params)
    jax.block_until_ready((embs, logits))

    ref_embs, ref_logits = evnet_reference(x, params)
    assert embs.shape == (B, EMBED_DIMS) and logits.shape == (B, NUM_CLASSES)
    # bf16 patches / conv weights on the MXU set the error floor (~1e-3); 1e-2
    # tolerance still catches any padding / layout mistake (those are O(1)).
    assert jnp.allclose(embs, ref_embs, atol=1e-2, rtol=1e-2)
    assert jnp.allclose(logits, ref_logits, atol=1e-2, rtol=1e-2)

    print("KERNEL_OK")
</pallas_src>

<mosaic_0001>
module attributes {stable_mosaic.version = 11 : i64} {
  func.func @backbone_kernel(%arg0: i32, %arg1: i32, %arg2: memref<1x256x36xbf16, #tpu.memory_space<vmem>>, %arg3: memref<36x128xbf16, #tpu.memory_space<vmem>>, %arg4: memref<1x128xf32, #tpu.memory_space<vmem>>, %arg5: memref<1x1x128xf32, #tpu.memory_space<vmem>>, %arg6: memref<1x128xf32, #tpu.memory_space<vmem>>) attributes {dimension_semantics = [#tpu.dimension_semantics<parallel>, #tpu.dimension_semantics<arbitrary>], iteration_bounds = array<i64: 2, 1>, scalar_prefetch = 0 : i64, scratch_operands = 1 : i64, tpu.core_type = #tpu.core_type<tc>, window_params = [{transform_indices = @transform_0, window_bounds = array<i64: 1, 256, 36>}, {pipeline_mode = #tpu.pipeline_mode<synchronous>, transform_indices = @transform_1, window_bounds = array<i64: 36, 128>}, {pipeline_mode = #tpu.pipeline_mode<synchronous>, transform_indices = @transform_2, window_bounds = array<i64: 1, 128>}, {transform_indices = @transform_3, window_bounds = array<i64: 1, 1, 128>}]} {
    %c0_i32 = arith.constant 0 : i32
    %0 = arith.cmpi eq, %arg1, %c0_i32 : i32
    %1 = arith.extui %0 : i1 to i32
    %c0_i32_0 = arith.constant 0 : i32
    %2 = arith.cmpi ne, %1, %c0_i32_0 : i32
    scf.if %2 {
      %cst_15 = arith.constant 0.000000e+00 : f32
      %20 = vector.broadcast %cst_15 : f32 to vector<1x128xf32>
      %c0_16 = arith.constant 0 : index
      %c0_17 = arith.constant 0 : index
      %21 = vector.load %arg6[%c0_16, %c0_17] : memref<1x128xf32, #tpu.memory_space<vmem>>, vector<1x128xf32>
      tpu.vector_store %arg6[%c0_16, %c0_17], %20 {strides = array<i32>} : memref<1x128xf32, #tpu.memory_space<vmem>>, vector<1x128xf32>,
    } else {
    }
    %c0 = arith.constant 0 : index
    %c0_1 = arith.constant 0 : index
    %c0_2 = arith.constant 0 : index
    %3 = vector.load %arg2[%c0, %c0_1, %c0_2] : memref<1x256x36xbf16, #tpu.memory_space<vmem>>, vector<1x256x36xbf16>
    %4 = vector.shape_cast %3 : vector<1x256x36xbf16> to vector<256x36xbf16>
    %c0_3 = arith.constant 0 : index
    %c0_4 = arith.constant 0 : index
    %5 = vector.load %arg3[%c0_3, %c0_4] : memref<36x128xbf16, #tpu.memory_space<vmem>>, vector<36x128xbf16>
    %cst = arith.constant dense<0.000000e+00> : vector<256x128xf32>
    %6 = tpu.matmul %4, %5, %cst {dimension_numbers = #tpu.dot_dimension_numbers<[1], [0], [0], [1], [0, 0, 1, 1], [], []>} : vector<256x36xbf16>, vector<36x128xbf16>, vector<256x128xf32> -> vector<256x128xf32>
    %c0_5 = arith.constant 0 : index
    %c0_6 = arith.constant 0 : index
    %7 = vector.load %arg4[%c0_5, %c0_6] : memref<1x128xf32, #tpu.memory_space<vmem>>, vector<1x128xf32>
    %8 = vector.broadcast %7 : vector<1x128xf32> to vector<256x128xf32>
    %9 = arith.addf %6, %8 : vector<256x128xf32>
    %cst_7 = arith.constant 0.000000e+00 : f32
    %10 = vector.broadcast %cst_7 : f32 to vector<256x128xf32>
    %11 = arith.maximumf %9, %10 : vector<256x128xf32>
    %c0_8 = arith.constant 0 : index
    %c0_9 = arith.constant 0 : index
    %12 = vector.load %arg6[%c0_8, %c0_9] : memref<1x128xf32, #tpu.memory_space<vmem>>, vector<1x128xf32>
    %cst_10 = arith.constant dense<0.000000e+00> : vector<128xf32>
    %13 = vector.multi_reduction <add>, %11, %cst_10 [0] : vector<256x128xf32> to vector<128xf32>
    %14 = vector.shape_cast %13 : vector<128xf32> to vector<1x128xf32>
    %15 = arith.addf %12, %14 : vector<1x128xf32>
    %c0_11 = arith.constant 0 : index
    %c0_12 = arith.constant 0 : index
    %16 = vector.load %arg6[%c0_11, %c0_12] : memref<1x128xf32, #tpu.memory_space<vmem>>, vector<1x128xf32>
    tpu.vector_store %arg6[%c0_11, %c0_12], %15 {strides = array<i32>} : memref<1x128xf32, #tpu.memory_space<vmem>>, vector<1x128xf32>,
    %c0_i32_13 = arith.constant 0 : i32
    %17 = arith.cmpi eq, %arg1, %c0_i32_13 : i32
    %18 = arith.extui %17 : i1 to i32
    %c0_i32_14 = arith.constant 0 : i32
    %19 = arith.cmpi ne, %18, %c0_i32_14 : i32
    scf.if %19 {
      %c0_15 = arith.constant 0 : index
      %c0_16 = arith.constant 0 : index
      %20 = vector.load %arg6[%c0_15, %c0_16] : memref<1x128xf32, #tpu.memory_space<vmem>>, vector<1x128xf32>
      %cst_17 = arith.constant 3.906250e-03 : f32
      %21 = vector.broadcast %cst_17 : f32 to vector<1x128xf32>
      %22 = arith.mulf %20, %21 : vector<1x128xf32>
      %c0_18 = arith.constant 0 : index
      %c0_19 = arith.constant 0 : index
      %c0_20 = arith.constant 0 : index
      %23 = vector.load %arg5[%c0_18, %c0_19, %c0_20] : memref<1x1x128xf32, #tpu.memory_space<vmem>>, vector<1x1x128xf32>
      %24 = vector.shape_cast %23 : vector<1x1x128xf32> to vector<1x128xf32>
      %25 = vector.shape_cast %22 : vector<1x128xf32> to vector<1x1x128xf32>
      tpu.vector_store %arg5[%c0_18, %c0_19, %c0_20], %25 {strides = array<i32>} : memref<1x1x128xf32, #tpu.memory_space<vmem>>, vector<1x1x128xf32>,
    } else {
    }
    return
  }
  func.func @transform_0(%arg0: i32, %arg1: i32) -> (i32, i32, i32) {
    %c0_i32 = arith.constant 0 : i32
    %c0_i32_0 = arith.constant 0 : i32
    return %arg0, %arg1, %c0_i32 : i32, i32, i32
  }
  func.func @transform_1(%arg0: i32, %arg1: i32) -> (i32, i32) {
    %c0_i32 = arith.constant 0 : i32
    %c0_i32_0 = arith.constant 0 : i32
    %c0_i32_1 = arith.constant 0 : i32
    return %c0_i32, %c0_i32_0 : i32, i32
  }
  func.func @transform_2(%arg0: i32, %arg1: i32) -> (i32, i32) {
    %c0_i32 = arith.constant 0 : i32
    %c0_i32_0 = arith.constant 0 : i32
    %c0_i32_1 = arith.constant 0 : i32
    return %c0_i32, %c0_i32_0 : i32, i32
  }
  func.func @transform_3(%arg0: i32, %arg1: i32) -> (i32, i32, i32) {
    %c0_i32 = arith.constant 0 : i32
    %c0_i32_0 = arith.constant 0 : i32
    %c0_i32_1 = arith.constant 0 : i32
    return %arg0, %c0_i32, %c0_i32_0 : i32, i32, i32
  }
}

</mosaic_0001>

<bundles_post_ra>
// kernel: tpu_custom_call.1
= control target key start
LH: loop header
LB: loop body
LE: loop exit
PB: predicated region body
PF: predicated region fallthrough
CT: control target
= control target key end

     0   :  { %8 = vsyncpa [#allocation4], 0  ;;  %s1214_s0 = inlined_call_operand.vmem [shape: bf16[2,256,36], index: 0, kind: input, shape index: {}]   ;;  %s1215_s1 = inlined_call_operand.vmem [shape: bf16[36,128], index: 1, kind: input, shape index: {}]   ;;  %s1216_s2 = inlined_call_operand.vmem [shape: f32[1,128], index: 2, kind: input, shape index: {}]   ;;  %s1217_s3 = inlined_call_operand.hbm [shape: f32[2,1,128], index: 3, kind: output, shape index: {}]  }
   0x1   :  { %10 = vsyncpa [#allocation4 + $0x1], 0  ;;  %s1004_s12 = smov 0   ;;  %s1006_s13 = smov 0  }
   0x2   :  { %s1008_s14 = smov 0   ;;  %s1010_s15 = smov 0  }
   0x3   :  { %s1012_s16 = smov 0   ;;  %s1014_s17 = smov 0  }
   0x4 LB: > { %s715_s18 = sadd.s32 4294967295, %s980_s17   ;;  %s716_s19 = sadd.s32 4294967294, %s980_s17   ;;  %s980_s17 = sphi %s1014_s17, %s16_s17   ;;  %s976_s16 = sphi %s1012_s16, %s1224_s16   ;;  %s972_s15 = sphi %s1010_s15, %s1223_s15   ;;  %s968_s14 = sphi %s1008_s14, %s1222_s14   ;;  %s964_s13 = sphi %s1006_s13, %s1221_s13   ;;  %s960_s12 = sphi %s1004_s12, %s1220_s12  }
   0x5   : > { %s28_s20 = sadd.s32 1, %s976_s16  ;;  %s105_s21 = sadd.s32 1, %s968_s14 }
   0x6   : > { %p30_p0 = scmp.ge.s32.totalorder %s28_s20, 2  ;;  %p115_p1 = scmp.ne.s32.totalorder %s968_s14, %s964_s13 }
   0x7   : > { %p116_p2 = scmp.eq.s32.totalorder %s715_s18, 1  ;;  %p121_p3 = scmp.ne.s32.totalorder %s964_s13, %s960_s12 }
   0x8   : > { %s1226_s20 = smov (%p30_p0, %s28_s20), 0  ;;  %p122_p5 = scmp.eq.s32.totalorder %s716_s19, 1 }
   0x9   : > { %p1044_p4 = por %p116_p2, %p115_p1  ;;  %s102_s23 = ssub.s32 %s976_s16, %s1226_s20 }
   0xa   : > { %p719_p6 = scmp.ge.s32.totalorder %s980_s17, 1  ;;  %p103_p7 = scmp.eq.s32.totalorder %s102_s23, 0 }
   0xb   : > { %p1051_p8 = por %p122_p5, %p121_p3  ;;  %p159_p9 = scmp.lt.s32.totalorder %s980_s17, 3 }
   0xc   : > { %s1057_s25 = scalar_select %p103_p7, %s968_s14, %s105_s21  }
   0xd   : > { %p160_p10 = pnand %p719_p6, %p159_p9 }
   0xe   : > { %v883_v0 = vld [vmem:[%s1215_s1] sm:$0xff] (!%p160_p10)   ;;  %v884_v1 = vld [vmem:[%s1215_s1 + $0x8] sm:$0xff] (!%p160_p10)   ;;  %p187_p11 = scmp.lt.s32.totalorder (!%p160_p10), %s972_s15, 1  ;;  %v885_v2 = vld [vmem:[%s1215_s1 + $0x10] ss:$0 sps:$4 sm:$0x33] (!%p160_p10)  }
   0xf   : > { %163 = sbr.rel (%p160_p10) target bundleno = 347 (0x15b), region = 32  ;;  %781 = vmatprep.subr.bf16.mxu0 (!%p160_p10), %v883_v0  ;;  %819 = vmatprep.subr.bf16.mxu1 (!%p160_p10), %v883_v0  ;;  %vm390_vm0 = vcmask (!%p160_p10), 1041408   ;;  %vm341_vm1 = vcmask (!%p160_p10), 293888   ;;  %v982_v20 = vmov (!%p160_p10), 0.0   ;;  %v1110_v21 = vld [vmem:[%s1216_s2] ss:$0 sm:$0xff] (!%p160_p10) }
  0x10   : > { %782 = vmatpush3.bf16.msra.mxu0 (!%p160_p10), %v883_v0  ;;  %822 = vmatpush3.bf16.msra.mxu1 (!%p160_p10), %v883_v0  ;;  %v392_v4 = vsel (!%p160_p10), %vm390_vm0, %v885_v2, 0  ;;  %201 = vst [vmem:[#allocation2] sm:$0x1] (!%p160_p10), %v982_v20  ;;  %s184_s18 = sand.u32 (!%p160_p10), 1, %s964_s13   ;;  %s758_s19 = sshll.u32 (!%p160_p10), %s972_s15, 4 }
  0x11   : > { %783 = vmatprep.subr.bf16.mxu0 (!%p160_p10), %v884_v1  ;;  %820 = vmatprep.subr.bf16.mxu1 (!%p160_p10), %v884_v1  ;;  %s185_s21 = scalar_lea.vmem (!%p160_p10), [#allocation3], %s184_s18  ;;  %s1167_s28 = scalar_lea.hbm (!%p160_p10), %s1217_s3, %s758_s19 }
  0x12   : > { %s646_s23 = sshll.u32 (!%p160_p10), %s185_s21, 4  ;;  %s634_s29 = scalar_lea.sflag (!%p160_p10), [#allocation4], %s184_s18  ;;  %s1169_s23 = int_to_ptr.vmem [resolvable:$true] %s646_s23 }
  0x14   : > { %784 = vmatpush3.bf16.msra.mxu0 (!%p160_p10), %v884_v1  ;;  %823 = vmatpush3.bf16.msra.mxu1 (!%p160_p10), %v884_v1 }
  0x15   : > { %825 = vmatprep.subr.msk.bf16.mxu0 (!%p160_p10), %vm390_vm0, %v885_v2  ;;  %826 = vmatprep.subr.msk.bf16.mxu1 (!%p160_p10), %vm390_vm0, %v885_v2 }
  0x16   : > { %s188_s30 = scalar_select %p187_p11, %s972_s15, 1 }
  0x17   : > { %s983_s15 = smov [#allocation3]  }
  0x18   : > { %s761_s6 = sshll.u32 %s188_s30, 7  ;;  %786 = vmatpush3.bf16.msra.mxu0 %v392_v4  ;;  %824 = vmatpush3.bf16.msra.mxu1 %v392_v4  ;;  %s902_s30 = scalar_lea.vmem %s1169_s23, 16 }
  0x19   : > { %s1073_s9 = scalar_lea.vmem %s1214_s0, %s761_s6  ;;  %p903_p12 = scmp.ne.s32.totalorder %s1169_s23, %s902_s30 }
  0x1a   : > { %v886_v3 = vld [vmem:[%s1073_s9] sm:$0xff]   ;;  %v887_v5 = vld [vmem:[%s1073_s9 + $0x8] sm:$0xff]   ;;  %v888_v6 = vld [vmem:[%s1073_s9 + $0x10] sm:$0xff]   ;;  %s906_s4 = sshll.u32 %s983_s15, 4  ;;  %s907_s4 = int_to_ptr.vmem [resolvable:$false] %s906_s4 }
  0x1b   : > { %787 = vmatprep.mubr.msk.bf16.mxu0 %vm341_vm1, %v886_v3  ;;  %v894_v7 = vld [vmem:[%s1073_s9 + $0x40] sm:$0xff]   ;;  %v895_v8 = vld [vmem:[%s1073_s9 + $0x48] sm:$0xff]   ;;  %v896_v9 = vld [vmem:[%s1073_s9 + $0x50] sm:$0xff]   ;;  %p904_p13 = pnand %p903_p12, %p1044_p4  ;;  %s908_s5 = scalar_lea.vmem %s907_s4, 32 }
  0x1c   : > { %788 = vmatmul.mubr.msk.bf16.vlgmr.msra.gmra.mrb[0].mxu0 %vm341_vm1, %v887_v5  ;;  %803 = vmatprep.mubr.msk.bf16.mxu1 %vm341_vm1, %v894_v7  ;;  %v889_v10 = vld [vmem:[%s1073_s9 + $0x18] sm:$0xff]   ;;  %v890_v11 = vld [vmem:[%s1073_s9 + $0x20] sm:$0xff]   ;;  %v891_v14 = vld [vmem:[%s1073_s9 + $0x28] sm:$0xff]   ;;  %p909_p1 = scmp.lt.s32.totalorder %s1169_s23, %s907_s4  ;;  %p910_p2 = scmp.lt.s32.totalorder %s908_s5, %s902_s30 }
  0x1d   : > { %791 = vmatprep.mubr.msk.bf16.mxu0 %vm341_vm1, %v888_v6  ;;  %804 = vmatmul.mubr.msk.bf16.vlgmr.msra.gmra.mrb[0].mxu1 %vm341_vm1, %v895_v8  ;;  %v897_v12 = vld [vmem:[%s1073_s9 + $0x58] sm:$0xff]   ;;  %v898_v13 = vld [vmem:[%s1073_s9 + $0x60] sm:$0xff]   ;;  %v892_v15 = vld [vmem:[%s1073_s9 + $0x30] sm:$0xff]   ;;  %p905_p0 = pneg %p904_p13 }
  0x1e   : > { %807 = vmatprep.mubr.msk.bf16.mxu1 %vm341_vm1, %v896_v9  ;;  %v899_v16 = vld [vmem:[%s1073_s9 + $0x68] sm:$0xff]   ;;  %v900_v17 = vld [vmem:[%s1073_s9 + $0x70] sm:$0xff]   ;;  %v893_v18 = vld [vmem:[%s1073_s9 + $0x38] sm:$0xff]   ;;  %p911_p3 = por %p910_p2, %p909_p1 }
  0x1f   : > { %v901_v19 = vld [vmem:[%s1073_s9 + $0x78] sm:$0xff]  }
  0x20   : > { %p912_p5 = pnand %p911_p3, %p905_p0 }
  0x24   : > { %792 = vmatmul.mubr.msk.bf16.gmra.mrb[4].mxu0 %vm341_vm1, %v889_v10 }
  0x25   : > { %795 = vmatprep.mubr.msk.bf16.mxu0 %vm341_vm1, %v890_v11  ;;  %808 = vmatmul.mubr.msk.bf16.gmra.mrb[4].mxu1 %vm341_vm1, %v897_v12 }
  0x26   : > { %811 = vmatprep.mubr.msk.bf16.mxu1 %vm341_vm1, %v898_v13 }
  0x2c   : > { %796 = vmatmul.mubr.msk.bf16.gmra.mrb[8].mxu0 %vm341_vm1, %v891_v14 }
  0x2d   : > { %799 = vmatprep.mubr.msk.bf16.mxu0 %vm341_vm1, %v892_v15  ;;  %812 = vmatmul.mubr.msk.bf16.gmra.mrb[8].mxu1 %vm341_vm1, %v899_v16 }
  0x2e   : > { %815 = vmatprep.mubr.msk.bf16.mxu1 %vm341_vm1, %v900_v17 }
  0x34   : > { %800 = vmatmul.mubr.msk.bf16.gmra.mrb[12].mxu0 %vm341_vm1, %v893_v18 }
  0x35   : > { %816 = vmatmul.mubr.msk.bf16.gmra.mrb[12].mxu1 %vm341_vm1, %v901_v19 }
  0xef   : > { %v789_v22 = vpop.f32.mrb[0].mxu0 }
  0xf0   : > { %v428_v23 = vpop.f32.mrb[1].mxu0  ;;  %v437_v27 = vadd.f32 %v789_v22, %v1110_v21  ;;  %v1115_v29 = vpop.f32.mrb[0].mxu1 }
  0xf1   : > { %v429_v24 = vadd.f32 %v1110_v21, %v428_v23  ;;  %v790_v25 = vpop.f32.mrb[2].mxu0  ;;  %v1117_v30 = vpop.f32.mrb[1].mxu1 }
  0xf2   : > { %v431_v26 = vpop.f32.mrb[3].mxu0  ;;  %v440_v32 = vadd.f32 %v790_v25, %v1110_v21  ;;  %v1120_v34 = vpop.f32.mrb[2].mxu1  ;;  %v557_v36 = vmax.f32 %v437_v27, 0.0 }
  0xf3   : > { %v432_v28 = vadd.f32 %v1110_v21, %v431_v26  ;;  %v555_v31 = vmax.f32 %v429_v24, 0.0  ;;  %v1122_v35 = vpop.f32.mrb[3].mxu1 }
  0xf4   : > { %v558_v40 = vmax.f32 %v440_v32, 0.0 }
  0xf5   : > { %v556_v33 = vmax.f32 %v432_v28, 0.0 }
  0xf7   : > { %v588_v37 = vadd.f32 %v556_v33, %v555_v31  ;;  %v793_v38 = vpop.f32.mrb[4].mxu0  ;;  %v493_v33 = vadd.f32 %v1110_v21, %v1117_v30 }
  0xf8   : > { %v444_v39 = vpop.f32.mrb[5].mxu0  ;;  %v453_v45 = vadd.f32 %v793_v38, %v1110_v21  ;;  %v1127_v49 = vpop.f32.mrb[4].mxu1 }
  0xf9   : > { %v589_v41 = vadd.f32 %v588_v37, %v557_v36  ;;  %v445_v42 = vadd.f32 %v1110_v21, %v444_v39  ;;  %v794_v43 = vpop.f32.mrb[6].mxu0  ;;  %v508_v50 = vpop.f32.mrb[5].mxu1 }
  0xfa   : > { %v447_v44 = vpop.f32.mrb[7].mxu0  ;;  %v456_v52 = vadd.f32 %v794_v43, %v1110_v21  ;;  %v1130_v54 = vpop.f32.mrb[6].mxu1  ;;  %v561_v56 = vmax.f32 %v453_v45, 0.0  ;;  %v496_v43 = vadd.f32 %v1110_v21, %v1122_v35  ;;  %v509_v30 = vadd.f32 %v1110_v21, %v508_v50 }
  0xfb   : > { %v559_v46 = vmax.f32 %v445_v42, 0.0  ;;  %v590_v47 = vadd.f32 %v589_v41, %v558_v40  ;;  %v448_v48 = vadd.f32 %v1110_v21, %v447_v44  ;;  %v511_v55 = vpop.f32.mrb[7].mxu1  ;;  %v571_v42 = vmax.f32 %v493_v33, 0.0 }
  0xfc   : > { %v562_v60 = vmax.f32 %v456_v52, 0.0  ;;  %v501_v44 = vadd.f32 %v1115_v29, %v1110_v21  ;;  %v517_v35 = vadd.f32 %v1127_v49, %v1110_v21 }
  0xfd   : > { %v591_v51 = vadd.f32 %v590_v47, %v559_v46  ;;  %v560_v53 = vmax.f32 %v448_v48, 0.0  ;;  %v504_v47 = vadd.f32 %v1120_v34, %v1110_v21  ;;  %v572_v48 = vmax.f32 %v496_v43, 0.0 }
  0xff   : > { %v592_v57 = vadd.f32 %v591_v51, %v560_v53  ;;  %v797_v58 = vpop.f32.mrb[8].mxu0  ;;  %v573_v51 = vmax.f32 %v501_v44, 0.0  ;;  %v574_v53 = vmax.f32 %v504_v47, 0.0 }
 0x100   : > { %v460_v59 = vpop.f32.mrb[9].mxu0  ;;  %v469_v1 = vadd.f32 %v797_v58, %v1110_v21  ;;  %v813_v5 = vpop.f32.mrb[8].mxu1  ;;  %v512_v58 = vadd.f32 %v1110_v21, %v511_v55 }
 0x101   : > { %v593_v61 = vadd.f32 %v592_v57, %v561_v56  ;;  %v461_v62 = vadd.f32 %v1110_v21, %v460_v59  ;;  %v798_v63 = vpop.f32.mrb[10].mxu0  ;;  %v524_v6 = vpop.f32.mrb[9].mxu1  ;;  %v575_v57 = vmax.f32 %v509_v30, 0.0  ;;  %v533_v55 = vadd.f32 %v813_v5, %v1110_v21 }
 0x102   : > { %v463_v0 = vpop.f32.mrb[11].mxu0  ;;  %v472_v8 = vadd.f32 %v798_v63, %v1110_v21  ;;  %v814_v10 = vpop.f32.mrb[10].mxu1  ;;  %v565_v12 = vmax.f32 %v469_v1, 0.0  ;;  %v525_v34 = vadd.f32 %v1110_v21, %v524_v6 }
 0x103   : > { %v563_v2 = vmax.f32 %v461_v62, 0.0  ;;  %v594_v3 = vadd.f32 %v593_v61, %v562_v60  ;;  %v464_v4 = vadd.f32 %v1110_v21, %v463_v0  ;;  %v527_v11 = vpop.f32.mrb[11].mxu1  ;;  %v520_v60 = vadd.f32 %v1130_v54, %v1110_v21 }
 0x104   : > { %v566_v16 = vmax.f32 %v472_v8, 0.0  ;;  %v576_v61 = vmax.f32 %v512_v58, 0.0  ;;  %v577_v62 = vmax.f32 %v517_v35, 0.0  ;;  %v579_v1 = vmax.f32 %v525_v34, 0.0 }
 0x105   : > { %v595_v7 = vadd.f32 %v594_v3, %v563_v2  ;;  %v564_v9 = vmax.f32 %v464_v4, 0.0  ;;  %v578_v63 = vmax.f32 %v520_v60, 0.0  ;;  %v528_v2 = vadd.f32 %v1110_v21, %v527_v11 }
 0x106   : > { %v536_v49 = vadd.f32 %v814_v10, %v1110_v21  ;;  %v581_v54 = vmax.f32 %v533_v55, 0.0 }
 0x107   : > { %v596_v13 = vadd.f32 %v595_v7, %v564_v9  ;;  %v801_v14 = vpop.f32.mrb[12].mxu0  ;;  %v580_v7 = vmax.f32 %v528_v2, 0.0 }
 0x108   : > { %v476_v15 = vpop.f32.mrb[13].mxu0  ;;  %v485_v22 = vadd.f32 %v801_v14, %v1110_v21  ;;  %v817_v26 = vpop.f32.mrb[12].mxu1 }
 0x109   : > { %v597_v17 = vadd.f32 %v596_v13, %v565_v12  ;;  %v477_v18 = vadd.f32 %v1110_v21, %v476_v15  ;;  %v802_v19 = vpop.f32.mrb[14].mxu0  ;;  %v540_v27 = vpop.f32.mrb[13].mxu1  ;;  %v582_v12 = vmax.f32 %v536_v49, 0.0  ;;  %v549_v15 = vadd.f32 %v817_v26, %v1110_v21 }
 0x10a   : > { %v479_v20 = vpop.f32.mrb[15].mxu0  ;;  %v488_v31 = vadd.f32 %v802_v19, %v1110_v21  ;;  %v818_v36 = vpop.f32.mrb[14].mxu1  ;;  %v569_v38 = vmax.f32 %v485_v22, 0.0  ;;  %v541_v8 = vadd.f32 %v1110_v21, %v540_v27 }
 0x10b   : > { %v567_v23 = vmax.f32 %v477_v18, 0.0  ;;  %v598_v24 = vadd.f32 %v597_v17, %v566_v16  ;;  %v480_v25 = vadd.f32 %v1110_v21, %v479_v20  ;;  %v543_v37 = vpop.f32.mrb[15].mxu1  ;;  %v552_v5 = vadd.f32 %v818_v36, %v1110_v21 }
 0x10c   : > { %v570_v40 = vmax.f32 %v488_v31, 0.0  ;;  %v583_v13 = vmax.f32 %v541_v8, 0.0  ;;  %v544_v14 = vadd.f32 %v1110_v21, %v543_v37  ;;  %v585_v10 = vmax.f32 %v549_v15, 0.0  ;;  %v587_v31 = vld [vmem:[#allocation2] sm:$0x1] }
 0x10d   : > { %v599_v28 = vadd.f32 %v598_v24, %v567_v23  ;;  %v568_v32 = vmax.f32 %v480_v25, 0.0  ;;  %v586_v19 = vmax.f32 %v552_v5, 0.0 }
 0x10e   : > { %v584_v17 = vmax.f32 %v544_v14, 0.0 }
 0x10f   : > { %v600_v39 = vadd.f32 %v599_v28, %v568_v32 }
 0x111   : > { %v601_v41 = vadd.f32 %v600_v39, %v569_v38 }
 0x113   : > { %v602_v45 = vadd.f32 %v601_v41, %v570_v40 }
 0x115   : > { %v603_v46 = vadd.f32 %v602_v45, %v571_v42 }
 0x117   : > { %v604_v52 = vadd.f32 %v603_v46, %v572_v48 }
 0x119   : > { %v605_v56 = vadd.f32 %v604_v52, %v573_v51 }
 0x11b   : > { %v606_v59 = vadd.f32 %v605_v56, %v574_v53 }
 0x11d   : > { %v607_v29 = vadd.f32 %v606_v59, %v575_v57 }
 0x11f   : > { %v608_v50 = vadd.f32 %v607_v29, %v576_v61 }
 0x121   : > { %v609_v0 = vadd.f32 %v608_v50, %v577_v62 }
 0x123   : > { %v610_v3 = vadd.f32 %v609_v0, %v578_v63 }
 0x125   : > { %v611_v4 = vadd.f32 %v610_v3, %v579_v1 }
 0x127   : > { %v612_v9 = vadd.f32 %v611_v4, %v580_v7 }
 0x129   : > { %v613_v6 = vadd.f32 %v612_v9, %v581_v54 }
 0x12b   : > { %v614_v16 = vadd.f32 %v613_v6, %v582_v12 }
 0x12d   : > { %v615_v11 = vadd.f32 %v614_v16, %v583_v13 }
 0x12f   : > { %v616_v18 = vadd.f32 %v615_v11, %v584_v17 }
 0x131   : > { %v617_v20 = vadd.f32 %v616_v18, %v585_v10 }
 0x133   : > { %v618_v22 = vadd.f32 %v617_v20, %v586_v19 }
 0x135   : > { %v619_v23 = vrot.slane %v618_v22, 4 }
 0x137   : > { %v620_v24 = vadd.f32 %v619_v23, %v618_v22 }
 0x139   : > { %v621_v25 = vrot.slane %v620_v24, 2 }
 0x13b   : > { %v622_v27 = vadd.f32 %v621_v25, %v620_v24 }
 0x13d   : > { %v623_v28 = vrot.slane %v622_v27, 1 }
 0x13f   : > { %v624_v26 = vadd.f32 %v623_v28, %v622_v27 }
 0x141   : > { %v625_v32 = vadd.f32 %v624_v26, %v587_v31 }
 0x143   : > { %626 = vst [vmem:[#allocation2] sm:$0x1] %v625_v32 }
 0x14a   : > { %v630_v21 = vld [vmem:[#allocation2] sm:$0x1] }
 0x14b   : > { %v631_v33 = vmul.f32 0.00390625, %v630_v21 }
 0x14d   : > { %632 = vst [vmem:[%s185_s21] sm:$0x1] %v631_v33 }
 0x14e   : > { %915 = shalt.err (!%p912_p5)
}
 0x14f   : > { %s916_s6 = scalar_lea.hbm %s1167_s28, 16  ;;  %s920_s9 = scalar_lea.hbm %s1217_s3, 32 }
 0x150   : > { %p917_p6 = scmp.ne.s32.totalorder %s1167_s28, %s916_s6  ;;  %p921_p10 = scmp.lt.u32.totalorder %s1167_s28, %s1217_s3 }
 0x151   : > { %p922_p11 = scmp.lt.u32.totalorder %s920_s9, %s916_s6  ;;  %p924_p13 = scmp.lt.u32.totalorder %s916_s6, %s1167_s28 }
 0x152   : > { %p918_p7 = pnand %p917_p6, %p1044_p4 }
 0x153   : > { %p923_p12 = por %p922_p11, %p921_p10 }
 0x154   : > { %p919_p9 = pneg %p918_p7 }
 0x155   : > { %p925_p0 = por %p924_p13, %p923_p12 }
 0x157   : > { %p926_p1 = pnand %p925_p0, %p919_p9 }
 0x159   : > { %929 = shalt.err (!%p926_p1)
}
 0x15a   : > { %827 = dma.vmem_to_hbm [thread:$0]  (%p1044_p4), %s1169_s23, 16, %s1167_s28, %s634_s29  }
 0x15b PF: > { %p833_p2 = scmp.ge.s32.totalorder %s980_s17, 2  ;;  %s658_s18 = sand.u32 1, %s960_s12  }
 0x15c   : > { %s659_s19 = scalar_lea.sflag [#allocation4], %s658_s18 }
 0x15d   : > { %p830_p3 = pnand %p833_p2, %p1051_p8 }
 0x15f   : > { %955 = dma.done.wait (!%p830_p3), %s659_s19, 16  }
 0x160   : > { %957 = vsyncadd (!%p830_p3), %s659_s19, 4294967280  ;;  %s16_s17 = sadd.s32 1, %s980_s17   ;;  %s1220_s12 = smov %s964_s13 }
 0x161   : > { %p13_p5 = scmp.ge.s32.totalorder %s16_s17, 4   ;;  %s1221_s13 = smov %s968_s14 }
 0x162   : > { %s1222_s14 = smov %s1057_s25  ;;  %s1223_s15 = smov %s976_s16 }
 0x163   : > { %s1224_s16 = smov %s1226_s20  ;;  %15 = sbr.rel (!%p13_p5) target bundleno = 4 (0x4), region = 75 }
 0x16a   :  { %663 = vsyncpa [#allocation4], 1 }
 0x16b   :  { %665 = vsyncpa [#allocation4 + $0x1], 1 }

</bundles_post_ra>
